<compile_context>
chip_gen: v7x
topology: tpu7x:2x2x1
jax: 0.10.0
libtpu: 0.0.40
codegen_flags: <defaults>
</compile_context>

<pallas_src>
import functools

import jax
import jax.numpy as jnp
import numpy as np
from jax.experimental import pallas as pl
from jax.experimental.pallas import tpu as pltpu


# ----------------------------------------------------------------------------
# Kernel: one batch-block of additive attention
# ----------------------------------------------------------------------------
def additive_attention_kernel(q_ref, v_ref, mask_ref,
                              wq_ref, wv_ref, b_ref, vvec_ref,
                              ctx_ref, *, tanh_dtype, use_mxu_vdot):
    f32 = jnp.float32
    vals = v_ref[...]                     # (BB, S, H) bf16  -- dominant HBM stream
    q = q_ref[...]                        # (BB, H)    f32
    mask = mask_ref[...]                  # (BB, S)    f32 additive
    Wq = wq_ref[...]                      # (H, H)     bf16 (query half of W, pre-transposed)
    Wv = wv_ref[...]                      # (H, H)     bf16 (value half of W, pre-transposed)
    bias = b_ref[...]                     # (1, H)     f32
    V = vvec_ref[...]                     # (1, H)     f32
    BB, S, H = vals.shape

    # Value-side projection: one (BB*S, H) @ (H, H) bf16 MXU matmul, f32 accumulate,
    # bias folded in exactly once.
    v_proj = (jnp.dot(vals.reshape(BB * S, H), Wv,
                      preferred_element_type=f32) + bias).reshape(BB, S, H)
    # Query-side projection: computed once (the query does not depend on s).
    q_proj = jnp.dot(q.astype(Wq.dtype), Wq, preferred_element_type=f32)     # (BB, H)

    # tanh over the largest tensor -- bf16 on v6e/v7x (bf16 EUP), f32 on v5e.
    score = jnp.tanh((q_proj[:, None, :] + v_proj).astype(tanh_dtype))       # (BB, S, H)

    if use_mxu_vdot:
        # H >= 128: put the V-dot on the (mostly idle) MXU instead of the XLU/VPU.
        logits = jnp.dot(score.reshape(BB * S, H),
                         V.astype(score.dtype).reshape(H, 1),
                         preferred_element_type=f32).reshape(BB, S)
    else:
        # Small H: a lane-reduce over H is cheap and avoids the (BB*S,1)->(BB,S) relayout.
        logits = jnp.sum(score.astype(f32) * V, axis=-1)                     # (BB, S)
    logits = logits + mask

    # Numerically stable softmax over S (all-masked rows -> uniform, never NaN).
    logits = logits - jnp.max(logits, axis=-1, keepdims=True)
    e = jnp.exp(logits)
    alpha = e * pl.reciprocal(jnp.sum(e, axis=-1, keepdims=True), approx=True)  # (BB, S)

    # context = sum_s alpha_s * values_s  (f32 accumulate over the bf16 values tile)
    ctx = jnp.sum(alpha[:, :, None] * vals.astype(f32), axis=1)              # (BB, H)
    ctx_ref[...] = ctx.astype(ctx_ref.dtype)


# ----------------------------------------------------------------------------
# Wrapper: weight split, chip-aware tiling/padding, launch
# ----------------------------------------------------------------------------
def _round_up(x, m):
    return (x + m - 1) // m * m


@jax.jit
def additive_attention(query, values, mask, W, b, V):
    """query (B,H), values (B,S,H), mask (B,S) additive, W (H,2H) torch-Linear weight,
    b (H,), V (1,H)  ->  context (B,H)"""
    B, S, H = values.shape
    f32, bf16 = jnp.float32, jnp.bfloat16

    # torch Linear does cat([q, v]) @ W.T + b  ->  q @ W[:, :H].T + v @ W[:, H:].T + b
    Wq = W[:, :H].T.astype(bf16)                 # (H, H) bf16 MXU operands
    Wv = W[:, H:].T.astype(bf16)                 # (H, H)
    b2 = b[None, :].astype(f32)                  # (1, H) bias added post-accumulate in f32
    Vr = V.astype(f32)                           # (1, H)

    # Pad S to a multiple of 8 so the in-kernel (BB,S,H)->(BB*S,H) reshape stays tile-aligned.
    S_pad = _round_up(S, 8)
    if S_pad != S:
        values = jnp.pad(values, ((0, 0), (0, S_pad - S), (0, 0)))
        mask = jnp.pad(mask, ((0, 0), (0, S_pad - S)), constant_values=-1e9)

    # Chip-aware budgets.
    kind = jax.devices()[0].device_kind.lower()
    is_v7 = ("v7" in kind) or ("7x" in kind)
    old_gen = any(g in kind for g in ("v2", "v3", "v4", "v5"))
    vmem_limit = (48 if is_v7 else 64) * 1024 * 1024     # v7x: 64 MiB phys; v5e/v6e: 128 MiB
    tanh_dtype = f32 if old_gen else bf16                # bf16 EUP only on v6e/v7x

    # Batch block: largest multiple of 8 whose working set (~4 live f32-sized copies of the
    # (BB,S,H) tile: double-buffered bf16 values + f32 v_proj/score/softmax temps) fits the
    # per-generation tile budget.
    tile_budget = (8 if is_v7 else 16) * 1024 * 1024
    per_row = 4 * S_pad * H * 4
    BB = max(8, min(512, tile_budget // max(per_row, 1)))
    BB = min(BB, _round_up(B, 8))
    if B >= 16 and BB >= B:            # keep >= 2 grid steps so v7x's 2 TCs both get work
        BB = _round_up(pl.cdiv(B, 2), 8)
    BB = max(8, (BB // 8) * 8)

    # Pad B to a multiple of BB (tail rows are computed then sliced off) -- never one giant block.
    B_pad = _round_up(B, BB)
    if B_pad != B:
        query = jnp.pad(query, ((0, B_pad - B), (0, 0)))
        values = jnp.pad(values, ((0, B_pad - B), (0, 0), (0, 0)))
        mask = jnp.pad(mask, ((0, B_pad - B), (0, 0)))

    grid = (B_pad // BB,)

    kernel = functools.partial(additive_attention_kernel,
                               tanh_dtype=tanh_dtype,
                               use_mxu_vdot=(H >= 128))

    cost = pl.CostEstimate(
        flops=2 * B_pad * S_pad * H * H + 2 * B_pad * H * H + 4 * B_pad * S_pad * H,
        transcendentals=B_pad * S_pad * H + B_pad * S_pad,
        bytes_accessed=(B_pad * S_pad * H * 2          # values (bf16)
                        + B_pad * H * 4                # query
                        + B_pad * S_pad * 4            # mask
                        + 2 * H * H * 2 + 2 * H * 4    # weights / bias / V
                        + B_pad * H * 4),              # output
    )

    ctx = pl.pallas_call(
        kernel,
        out_shape=jax.ShapeDtypeStruct((B_pad, H), f32),
        grid=grid,
        in_specs=[
            pl.BlockSpec((BB, H), lambda i: (i, 0)),            # query   (f32)
            pl.BlockSpec((BB, S_pad, H), lambda i: (i, 0, 0)),  # values  (bf16)
            pl.BlockSpec((BB, S_pad), lambda i: (i, 0)),        # mask    (f32)
            pl.BlockSpec((H, H), lambda i: (0, 0)),             # Wq      (bf16)
            pl.BlockSpec((H, H), lambda i: (0, 0)),             # Wv      (bf16)
            pl.BlockSpec((1, H), lambda i: (0, 0)),             # bias    (f32)
            pl.BlockSpec((1, H), lambda i: (0, 0)),             # V       (f32)
        ],
        out_specs=pl.BlockSpec((BB, H), lambda i: (i, 0)),
        compiler_params=pltpu.CompilerParams(
            dimension_semantics=("parallel",),                  # shard batch blocks across TCs
            vmem_limit_bytes=vmem_limit,
        ),
        cost_estimate=cost,
    )(query.astype(f32), values.astype(bf16), mask.astype(f32), Wq, Wv, b2, Vr)

    return ctx[:B]


# ----------------------------------------------------------------------------
# Pure-JAX reference mirroring the PyTorch forward exactly (for a sanity check)
# ----------------------------------------------------------------------------
def _reference(query, values, mask, W, b, V):
    B, S, H = values.shape
    qe = jnp.broadcast_to(query[:, None, :], (B, S, H))
    cat = jnp.concatenate([qe, values], axis=-1)                  # (B, S, 2H)
    score = jnp.tanh(cat @ W.T + b)                               # (B, S, H)
    logits = jnp.einsum("bsh,h->bs", score, V[0]) + mask          # (B, S)
    alpha = jax.nn.softmax(logits, axis=-1)
    return jnp.einsum("bs,bsh->bh", alpha, values)                # (B, H)


# ----------------------------------------------------------------------------
if __name__ == "__main__":
    B, S, H = 2, 8, 32

    key = jax.random.PRNGKey(0)
    kq, kv, kw, kb, kV = jax.random.split(key, 5)

    query = jax.random.normal(kq, (B, H), jnp.float32)
    values = jax.random.normal(kv, (B, S, H), jnp.float32)

    lengths = jnp.array([8, 5], dtype=jnp.int32)
    t = jnp.arange(S, dtype=jnp.int32)[None, :]
    mask = jnp.where(t < lengths[:, None], 0.0, -1e9).astype(jnp.float32)   # additive mask

    s = 1.0 / np.sqrt(2 * H)
    W = jax.random.uniform(kw, (H, 2 * H), jnp.float32, -s, s)   # torch Linear(2H -> H) weight
    b = jax.random.uniform(kb, (H,), jnp.float32, -s, s)
    V = 0.1 * jax.random.normal(kV, (1, H), jnp.float32)         # nn.init.normal_(V, 0, 0.1)

    ctx = additive_attention(query, values, mask, W, b, V)
    ctx = jax.block_until_ready(ctx)

    expect = _reference(query, values, mask, W, b, V)

    assert ctx.shape == (B, H)
    assert bool(jnp.all(jnp.isfinite(ctx)))
    # bf16 MXU operands / bf16 tanh (f32 accumulation) -> small drift vs. the f32 reference.
    np.testing.assert_allclose(np.asarray(ctx), np.asarray(expect), rtol=2e-2, atol=2e-2)
    print("KERNEL_OK")
</pallas_src>

<mosaic_0001>
module attributes {stable_mosaic.version = 11 : i64} {
  func.func @additive_attention_kernel(%arg0: i32, %arg1: memref<8x32xf32, #tpu.memory_space<vmem>>, %arg2: memref<8x8x32xbf16, #tpu.memory_space<vmem>>, %arg3: memref<8x8xf32, #tpu.memory_space<vmem>>, %arg4: memref<32x32xbf16, #tpu.memory_space<vmem>>, %arg5: memref<32x32xbf16, #tpu.memory_space<vmem>>, %arg6: memref<1x32xf32, #tpu.memory_space<vmem>>, %arg7: memref<1x32xf32, #tpu.memory_space<vmem>>, %arg8: memref<8x32xf32, #tpu.memory_space<vmem>>) attributes {dimension_semantics = [#tpu.dimension_semantics<parallel>], iteration_bounds = array<i64: 1>, scalar_prefetch = 0 : i64, scratch_operands = 0 : i64, tpu.core_type = #tpu.core_type<tc>, window_params = [{transform_indices = @transform_0, window_bounds = array<i64: 8, 32>}, {transform_indices = @transform_1, window_bounds = array<i64: 8, 8, 32>}, {transform_indices = @transform_2, window_bounds = array<i64: 8, 8>}, {pipeline_mode = #tpu.pipeline_mode<synchronous>, transform_indices = @transform_3, window_bounds = array<i64: 32, 32>}, {pipeline_mode = #tpu.pipeline_mode<synchronous>, transform_indices = @transform_4, window_bounds = array<i64: 32, 32>}, {pipeline_mode = #tpu.pipeline_mode<synchronous>, transform_indices = @transform_5, window_bounds = array<i64: 1, 32>}, {pipeline_mode = #tpu.pipeline_mode<synchronous>, transform_indices = @transform_6, window_bounds = array<i64: 1, 32>}, {transform_indices = @transform_7, window_bounds = array<i64: 8, 32>}]} {
    %c0 = arith.constant 0 : index
    %c0_0 = arith.constant 0 : index
    %c0_1 = arith.constant 0 : index
    %0 = vector.load %arg2[%c0, %c0_0, %c0_1] : memref<8x8x32xbf16, #tpu.memory_space<vmem>>, vector<8x8x32xbf16>
    %c0_2 = arith.constant 0 : index
    %c0_3 = arith.constant 0 : index
    %1 = vector.load %arg1[%c0_2, %c0_3] : memref<8x32xf32, #tpu.memory_space<vmem>>, vector<8x32xf32>
    %c0_4 = arith.constant 0 : index
    %c0_5 = arith.constant 0 : index
    %2 = vector.load %arg3[%c0_4, %c0_5] : memref<8x8xf32, #tpu.memory_space<vmem>>, vector<8x8xf32>
    %c0_6 = arith.constant 0 : index
    %c0_7 = arith.constant 0 : index
    %3 = vector.load %arg4[%c0_6, %c0_7] : memref<32x32xbf16, #tpu.memory_space<vmem>>, vector<32x32xbf16>
    %c0_8 = arith.constant 0 : index
    %c0_9 = arith.constant 0 : index
    %4 = vector.load %arg5[%c0_8, %c0_9] : memref<32x32xbf16, #tpu.memory_space<vmem>>, vector<32x32xbf16>
    %c0_10 = arith.constant 0 : index
    %c0_11 = arith.constant 0 : index
    %5 = vector.load %arg6[%c0_10, %c0_11] : memref<1x32xf32, #tpu.memory_space<vmem>>, vector<1x32xf32>
    %c0_12 = arith.constant 0 : index
    %c0_13 = arith.constant 0 : index
    %6 = vector.load %arg7[%c0_12, %c0_13] : memref<1x32xf32, #tpu.memory_space<vmem>>, vector<1x32xf32>
    %7 = vector.shape_cast %0 : vector<8x8x32xbf16> to vector<64x32xbf16>
    %cst = arith.constant dense<0.000000e+00> : vector<64x32xf32>
    %8 = tpu.matmul %7, %4, %cst {dimension_numbers = #tpu.dot_dimension_numbers<[1], [0], [0], [1], [0, 0, 1, 1], [], []>} : vector<64x32xbf16>, vector<32x32xbf16>, vector<64x32xf32> -> vector<64x32xf32>
    %9 = vector.broadcast %5 : vector<1x32xf32> to vector<64x32xf32>
    %10 = arith.addf %8, %9 : vector<64x32xf32>
    %11 = vector.shape_cast %10 : vector<64x32xf32> to vector<8x8x32xf32>
    %12 = arith.truncf %1 : vector<8x32xf32> to vector<8x32xbf16>
    %cst_14 = arith.constant dense<0.000000e+00> : vector<8x32xf32>
    %13 = tpu.matmul %12, %3, %cst_14 {dimension_numbers = #tpu.dot_dimension_numbers<[1], [0], [0], [1], [0, 0, 1, 1], [], []>} : vector<8x32xbf16>, vector<32x32xbf16>, vector<8x32xf32> -> vector<8x32xf32>
    %14 = vector.shape_cast %13 : vector<8x32xf32> to vector<8x1x32xf32>
    %15 = vector.broadcast %14 : vector<8x1x32xf32> to vector<8x8x32xf32>
    %16 = arith.addf %15, %11 : vector<8x8x32xf32>
    %17 = arith.truncf %16 : vector<8x8x32xf32> to vector<8x8x32xbf16>
    %18 = math.tanh %17 : vector<8x8x32xbf16>
    %19 = arith.extf %18 : vector<8x8x32xbf16> to vector<8x8x32xf32>
    %20 = vector.shape_cast %6 : vector<1x32xf32> to vector<1x1x32xf32>
    %21 = vector.broadcast %20 : vector<1x1x32xf32> to vector<8x8x32xf32>
    %22 = arith.mulf %19, %21 : vector<8x8x32xf32>
    %cst_15 = arith.constant dense<0.000000e+00> : vector<8x8xf32>
    %23 = vector.multi_reduction <add>, %22, %cst_15 [2] : vector<8x8x32xf32> to vector<8x8xf32>
    %24 = arith.addf %23, %2 : vector<8x8xf32>
    %cst_16 = arith.constant dense<0xFF800000> : vector<8xf32>
    %25 = vector.multi_reduction <maximumf>, %24, %cst_16 [1] : vector<8x8xf32> to vector<8xf32>
    %26 = vector.shape_cast %25 : vector<8xf32> to vector<8x1xf32>
    %27 = vector.broadcast %26 : vector<8x1xf32> to vector<8x8xf32>
    %28 = arith.subf %24, %27 : vector<8x8xf32>
    %29 = math.exp %28 : vector<8x8xf32>
    %cst_17 = arith.constant dense<0.000000e+00> : vector<8xf32>
    %30 = vector.multi_reduction <add>, %29, %cst_17 [1] : vector<8x8xf32> to vector<8xf32>
    %31 = vector.shape_cast %30 : vector<8xf32> to vector<8x1xf32>
    %32 = tpu.reciprocal %31 {approx = true} : vector<8x1xf32> -> vector<8x1xf32>
    %33 = vector.broadcast %32 : vector<8x1xf32> to vector<8x8xf32>
    %34 = arith.mulf %29, %33 : vector<8x8xf32>
    %35 = vector.shape_cast %34 : vector<8x8xf32> to vector<8x8x1xf32>
    %36 = arith.extf %0 : vector<8x8x32xbf16> to vector<8x8x32xf32>
    %37 = vector.broadcast %35 : vector<8x8x1xf32> to vector<8x8x32xf32>
    %38 = arith.mulf %37, %36 : vector<8x8x32xf32>
    %cst_18 = arith.constant dense<0.000000e+00> : vector<8x32xf32>
    %39 = vector.multi_reduction <add>, %38, %cst_18 [1] : vector<8x8x32xf32> to vector<8x32xf32>
    %c0_19 = arith.constant 0 : index
    %c0_20 = arith.constant 0 : index
    %40 = vector.load %arg8[%c0_19, %c0_20] : memref<8x32xf32, #tpu.memory_space<vmem>>, vector<8x32xf32>
    tpu.vector_store %arg8[%c0_19, %c0_20], %39 {strides = array<i32>} : memref<8x32xf32, #tpu.memory_space<vmem>>, vector<8x32xf32>,
    return
  }
  func.func @transform_0(%arg0: i32) -> (i32, i32) {
    %c0_i32 = arith.constant 0 : i32
    %c0_i32_0 = arith.constant 0 : i32
    return %arg0, %c0_i32 : i32, i32
  }
  func.func @transform_1(%arg0: i32) -> (i32, i32, i32) {
    %c0_i32 = arith.constant 0 : i32
    %c0_i32_0 = arith.constant 0 : i32
    %c0_i32_1 = arith.constant 0 : i32
    return %arg0, %c0_i32, %c0_i32_0 : i32, i32, i32
  }
  func.func @transform_2(%arg0: i32) -> (i32, i32) {
    %c0_i32 = arith.constant 0 : i32
    %c0_i32_0 = arith.constant 0 : i32
    return %arg0, %c0_i32 : i32, i32
  }
  func.func @transform_3(%arg0: i32) -> (i32, i32) {
    %c0_i32 = arith.constant 0 : i32
    %c0_i32_0 = arith.constant 0 : i32
    %c0_i32_1 = arith.constant 0 : i32
    return %c0_i32, %c0_i32_0 : i32, i32
  }
  func.func @transform_4(%arg0: i32) -> (i32, i32) {
    %c0_i32 = arith.constant 0 : i32
    %c0_i32_0 = arith.constant 0 : i32
    %c0_i32_1 = arith.constant 0 : i32
    return %c0_i32, %c0_i32_0 : i32, i32
  }
  func.func @transform_5(%arg0: i32) -> (i32, i32) {
    %c0_i32 = arith.constant 0 : i32
    %c0_i32_0 = arith.constant 0 : i32
    %c0_i32_1 = arith.constant 0 : i32
    return %c0_i32, %c0_i32_0 : i32, i32
  }
  func.func @transform_6(%arg0: i32) -> (i32, i32) {
    %c0_i32 = arith.constant 0 : i32
    %c0_i32_0 = arith.constant 0 : i32
    %c0_i32_1 = arith.constant 0 : i32
    return %c0_i32, %c0_i32_0 : i32, i32
  }
  func.func @transform_7(%arg0: i32) -> (i32, i32) {
    %c0_i32 = arith.constant 0 : i32
    %c0_i32_0 = arith.constant 0 : i32
    return %arg0, %c0_i32 : i32, i32
  }
}

</mosaic_0001>

<bundles_post_ra>
// kernel: additive_attention.1
= control target key start
LH: loop header
LB: loop body
LE: loop exit
PB: predicated region body
PF: predicated region fallthrough
CT: control target
= control target key end

     0   :  { %12 = vsyncpa [#allocation3], 0  ;;  %s1588_s0 = inlined_call_operand.hbm [shape: f32[8,32], index: 0, kind: input, shape index: {}]   ;;  %s1589_s1 = inlined_call_operand.hbm [shape: bf16[8,8,32], index: 1, kind: input, shape index: {}]   ;;  %s1590_s2 = inlined_call_operand.hbm [shape: f32[8,8], index: 2, kind: input, shape index: {}]   ;;  %s1591_s3 = inlined_call_operand.hbm [shape: bf16[32,32], index: 3, kind: input, shape index: {}]   ;;  %s1592_s4 = inlined_call_operand.hbm [shape: bf16[32,32], index: 4, kind: input, shape index: {}]   ;;  %s1593_s5 = inlined_call_operand.hbm [shape: f32[1,32], index: 5, kind: input, shape index: {}]   ;;  %s1594_s6 = inlined_call_operand.hbm [shape: f32[1,32], index: 6, kind: input, shape index: {}]   ;;  %s1595_s7 = inlined_call_operand.hbm [shape: f32[8,32], index: 7, kind: output, shape index: {}]  }
   0x1   :  { %13 = vsyncpa [#allocation6], 0 }
   0x2   :  { %14 = vsyncpa [#allocation9], 0 }
   0x3   :  { %15 = vsyncpa [#allocation12], 0 }
   0x4   :  { %16 = vsyncpa [#allocation4], 0  ;;  %s1254_s24 = smov [#allocation5]   ;;  %s1068_s28 = scalar_lea.hbm %s1589_s1, 512 }
   0x5   :  { %s32_s25 = sshll.u32 %s1254_s24, 4  ;;  %p1069_p0 = scmp.ne.s32.totalorder %s1589_s1, %s1068_s28  ;;  %s33_s25 = int_to_ptr.vmem [resolvable:$true] %s32_s25 }
   0x6   :  { %p1072_p1 = scmp.lt.u32.totalorder %s1068_s28, %s1589_s1 }
   0x8   :  { %p1074_p2 = pnand %p1072_p1, %p1069_p0 }
   0xa   :  { %1077 = shalt.err (!%p1074_p2)
}
   0xb   :  { %s1078_s10 = scalar_lea.vmem %s33_s25, 512  ;;  %p1083_p4 = scmp.lt.s32.totalorder %s33_s25, %s33_s25 }
   0xc   :  { %p1079_p3 = scmp.ne.s32.totalorder %s33_s25, %s1078_s10  ;;  %p1084_p5 = scmp.lt.s32.totalorder %s1078_s10, %s1078_s10 }
   0xe   :  { %p1085_p6 = por %p1084_p5, %p1083_p4 }
  0x10   :  { %p1086_p7 = pnand %p1085_p6, %p1079_p3 }
  0x12   :  { %1089 = shalt.err (!%p1086_p7)
}
  0x13   :  { %s1255_s11 = smov 64   ;;  %s1256_s12 = smov 4  }
  0x14   :  { %38 = dma.hbm_to_vmem [thread:$0]  %s1589_s1, 512, %s33_s25, [#allocation6], %s1255_s11, %s1255_s11, %s1256_s12  }
  0x15   :  { %s1257_s15 = smov [#allocation8]   ;;  %s1258_s17 = smov [#allocation11]  }
  0x16   :  { %s54_s16 = sshll.u32 %s1257_s15, 4  ;;  %s79_s18 = sshll.u32 %s1258_s17, 4  ;;  %s55_s16 = int_to_ptr.vmem [resolvable:$true] %s54_s16  ;;  %s80_s18 = int_to_ptr.vmem [resolvable:$true] %s79_s18 }
  0x17   :  { %s1090_s21 = scalar_lea.hbm %s1591_s3, 256 }
  0x18   :  { %p1091_p8 = scmp.ne.s32.totalorder %s1591_s3, %s1090_s21  ;;  %p1094_p9 = scmp.lt.u32.totalorder %s1090_s21, %s1591_s3 }
  0x1a   :  { %p1096_p10 = pnand %p1094_p9, %p1091_p8 }
  0x1c   :  { %1099 = shalt.err (!%p1096_p10)
}
  0x1d   :  { %s1100_s1 = scalar_lea.vmem %s55_s16, 256  ;;  %p1105_p12 = scmp.lt.s32.totalorder %s55_s16, %s55_s16 }
  0x1e   :  { %p1101_p11 = scmp.ne.s32.totalorder %s55_s16, %s1100_s1  ;;  %p1106_p13 = scmp.lt.s32.totalorder %s1100_s1, %s1100_s1 }
  0x20   :  { %p1107_p0 = por %p1106_p13, %p1105_p12 }
  0x22   :  { %p1108_p1 = pnand %p1107_p0, %p1101_p11 }
  0x24   :  { %1111 = shalt.err (!%p1108_p1)
}
  0x25   :  { %60 = dma.hbm_to_vmem [thread:$0]  %s1591_s3, 256, %s55_s16, [#allocation9], %s1255_s11, %s1255_s11, %s1256_s12  }
  0x26   :  { %s1112_s30 = scalar_lea.hbm %s1593_s5, 16 }
  0x27   :  { %p1113_p2 = scmp.ne.s32.totalorder %s1593_s5, %s1112_s30  ;;  %p1116_p3 = scmp.lt.u32.totalorder %s1112_s30, %s1593_s5 }
  0x29   :  { %p1118_p4 = pnand %p1116_p3, %p1113_p2 }
  0x2b   :  { %1121 = shalt.err (!%p1118_p4)
}
  0x2c   :  { %s1122_s14 = scalar_lea.vmem %s80_s18, 16  ;;  %s1126_s15 = scalar_lea.vmem %s80_s18, 32 }
  0x2d   :  { %p1123_p5 = scmp.ne.s32.totalorder %s80_s18, %s1122_s14  ;;  %p1127_p6 = scmp.lt.s32.totalorder %s80_s18, %s80_s18 }
  0x2e   :  { %p1128_p7 = scmp.lt.s32.totalorder %s1126_s15, %s1122_s14 }
  0x30   :  { %p1129_p8 = por %p1128_p7, %p1127_p6 }
  0x32   :  { %p1130_p9 = pnand %p1129_p8, %p1123_p5 }
  0x34   :  { %1133 = shalt.err (!%p1130_p9)
}
  0x35   :  { %82 = dma.hbm_to_vmem [thread:$0]  %s1593_s5, 16, %s80_s18, [#allocation12]  }
  0x36   :  { %s1259_s17 = smov [#allocation2]   ;;  %s1260_s20 = smov [#allocation7]  }
  0x37   :  { %s23_s19 = sshll.u32 %s1259_s17, 4  ;;  %s45_s21 = sshll.u32 %s1260_s20, 4  ;;  %s24_s19 = int_to_ptr.vmem [resolvable:$true] %s23_s19  ;;  %s46_s21 = int_to_ptr.vmem [resolvable:$true] %s45_s21 }
  0x38   :  { %s1134_s24 = scalar_lea.hbm %s1588_s0, 128 }
  0x39   :  { %p1135_p10 = scmp.ne.s32.totalorder %s1588_s0, %s1134_s24  ;;  %p1138_p11 = scmp.lt.u32.totalorder %s1134_s24, %s1588_s0 }
  0x3b   :  { %p1140_p12 = pnand %p1138_p11, %p1135_p10 }
  0x3d   :  { %1143 = shalt.err (!%p1140_p12)
}
  0x3e   :  { %s1144_s5 = scalar_lea.vmem %s24_s19, 128  ;;  %p1149_p0 = scmp.lt.s32.totalorder %s24_s19, %s24_s19 }
  0x3f   :  { %p1145_p13 = scmp.ne.s32.totalorder %s24_s19, %s1144_s5  ;;  %p1150_p1 = scmp.lt.s32.totalorder %s1144_s5, %s1144_s5 }
  0x41   :  { %p1151_p2 = por %p1150_p1, %p1149_p0 }
  0x43   :  { %p1152_p3 = pnand %p1151_p2, %p1145_p13 }
  0x45   :  { %1155 = shalt.err (!%p1152_p3)
}
  0x46   :  { %26 = dma.hbm_to_vmem [thread:$0]  %s1588_s0, 128, %s24_s19, [#allocation3]  }
  0x47   :  { %s1156_s8 = scalar_lea.hbm %s1590_s2, 128 }
  0x48   :  { %p1157_p4 = scmp.ne.s32.totalorder %s1590_s2, %s1156_s8  ;;  %p1160_p5 = scmp.lt.u32.totalorder %s1156_s8, %s1590_s2 }
  0x4a   :  { %p1162_p6 = pnand %p1160_p5, %p1157_p4 }
  0x4c   :  { %1165 = shalt.err (!%p1162_p6)
}
  0x4d   :  { %s1166_s15 = scalar_lea.vmem %s46_s21, 128  ;;  %p1171_p8 = scmp.lt.s32.totalorder %s46_s21, %s46_s21 }
  0x4e   :  { %p1167_p7 = scmp.ne.s32.totalorder %s46_s21, %s1166_s15  ;;  %p1172_p9 = scmp.lt.s32.totalorder %s1166_s15, %s1166_s15 }
  0x50   :  { %p1173_p10 = por %p1172_p9, %p1171_p8 }
  0x52   :  { %p1174_p11 = pnand %p1173_p10, %p1167_p7 }
  0x54   :  { %1177 = shalt.err (!%p1174_p11)
}
  0x55   :  { %48 = dma.hbm_to_vmem [thread:$0]  %s1590_s2, 128, %s46_s21, [#allocation6]  }
  0x56   :  { %s1261_s16 = smov [#allocation10]   ;;  %s1262_s19 = smov [#allocation13]  }
  0x57   :  { %s66_s17 = sshll.u32 %s1261_s16, 4  ;;  %s89_s20 = sshll.u32 %s1262_s19, 4  ;;  %s67_s17 = int_to_ptr.vmem [resolvable:$true] %s66_s17  ;;  %s90_s20 = int_to_ptr.vmem [resolvable:$true] %s89_s20 }
  0x58   :  { %s1178_s24 = scalar_lea.hbm %s1592_s4, 256 }
  0x59   :  { %p1179_p12 = scmp.ne.s32.totalorder %s1592_s4, %s1178_s24  ;;  %p1182_p13 = scmp.lt.u32.totalorder %s1178_s24, %s1592_s4 }
  0x5b   :  { %p1184_p0 = pnand %p1182_p13, %p1179_p12 }
  0x5d   :  { %1187 = shalt.err (!%p1184_p0)
}
  0x5e   :  { %s1188_s2 = scalar_lea.vmem %s67_s17, 256  ;;  %p1193_p2 = scmp.lt.s32.totalorder %s67_s17, %s67_s17 }
  0x5f   :  { %p1189_p1 = scmp.ne.s32.totalorder %s67_s17, %s1188_s2  ;;  %p1194_p3 = scmp.lt.s32.totalorder %s1188_s2, %s1188_s2 }
  0x61   :  { %p1195_p4 = por %p1194_p3, %p1193_p2 }
  0x63   :  { %p1196_p5 = pnand %p1195_p4, %p1189_p1 }
  0x65   :  { %1199 = shalt.err (!%p1196_p5)
}
  0x66   :  { %72 = dma.hbm_to_vmem [thread:$0]  %s1592_s4, 256, %s67_s17, [#allocation9], %s1255_s11, %s1255_s11, %s1256_s12  }
  0x67   :  { %s1200_s29 = scalar_lea.hbm %s1594_s6, 16 }
  0x68   :  { %p1201_p6 = scmp.ne.s32.totalorder %s1594_s6, %s1200_s29  ;;  %p1204_p7 = scmp.lt.u32.totalorder %s1200_s29, %s1594_s6 }
  0x6a   :  { %p1206_p8 = pnand %p1204_p7, %p1201_p6 }
  0x6c   :  { %1209 = shalt.err (!%p1206_p8)
}
  0x6d   :  { %s1210_s13 = scalar_lea.vmem %s90_s20, 16  ;;  %s1214_s14 = scalar_lea.vmem %s90_s20, 32 }
  0x6e   :  { %p1211_p9 = scmp.ne.s32.totalorder %s90_s20, %s1210_s13  ;;  %p1215_p10 = scmp.lt.s32.totalorder %s90_s20, %s90_s20 }
  0x6f   :  { %p1216_p11 = scmp.lt.s32.totalorder %s1214_s14, %s1210_s13 }
  0x71   :  { %p1217_p12 = por %p1216_p11, %p1215_p10 }
  0x73   :  { %p1218_p13 = pnand %p1217_p12, %p1211_p9 }
  0x75   :  { %1221 = shalt.err (!%p1218_p13)
}
  0x76   :  { %92 = dma.hbm_to_vmem [thread:$0]  %s1594_s6, 16, %s90_s20, [#allocation12]  }
  0x77   :  { %1244 = dma.done.wait [#allocation3], 128  }
  0x78   :  { %1245 = vsyncadd [#allocation3], 4294967168 }
  0x79   :  { %1246 = dma.done.wait [#allocation6], 640  }
  0x7a   :  { %1247 = vsyncadd [#allocation6], 4294966656 }
  0x7b   :  { %1248 = dma.done.wait [#allocation9], 512  }
  0x7c   :  { %1249 = vsyncadd [#allocation9], 4294966784 }
  0x7d   :  { %1250 = dma.done.wait [#allocation12], 32  }
  0x7e   :  { %1251 = vsyncadd [#allocation12], 4294967264  ;;  %v1263_v0 = vmov 0.0   ;;  %vm1264_vm0 = vmmov 0   ;;  %v312_v1 = vlaneseq  ;;  %v1022_v3 = vld [vmem:[#allocation10] sm:$0xff]   ;;  %v1023_v4 = vld [vmem:[#allocation8] sm:$0xff]  }
  0x7f   :  { %998 = vmatprep.subr.bf16.mxu1 %v1263_v0  ;;  %1002 = vmatprep.mubr.msk.bf16.mxu1 %vm1264_vm0, %v1263_v0  ;;  %v1024_v5 = vld [vmem:[#allocation10 + $0x8] sm:$0xff]   ;;  %v1025_v7 = vld [vmem:[#allocation8 + $0x8] sm:$0xff]   ;;  %v123_v10 = vld [vmem:[#allocation2] sm:$0xff]  ;;  %vm173_vm1 = vcmask 261120   ;;  %v1265_v26 = vmov 1966171168  }
  0x80   :  { %v1402_v2 = vshrl.u32 %v312_v1, 7  ;;  %986 = vmatprep.subr.bf16.mxu0 %v1022_v3  ;;  %999 = vmatpush3.bf16.msra.mxu1 %v1023_v4  ;;  %v1410_v9 = vld [vmem:[#allocation5] sm:$0xff]   ;;  %v1412_v11 = vld [vmem:[#allocation5 + $0x8] sm:$0xff]   ;;  %v1417_v13 = vld [vmem:[#allocation5 + $0x10] sm:$0xff]   ;;  %v251_v16 = vpack.c.bf16 %v123_v10, %v123_v10  ;;  %v310_v27 = vunpack.c.l.s4 %v1265_v26  ;;  %vm606_vm2 = vcmask 1041409   ;;  %s1267_s6 = smov [#allocation14]  }
  0x81   :  { %987 = vmatpush3.bf16.msra.mxu0 %v1022_v3  ;;  %1000 = vmatprep.subr.bf16.mxu1 %v1263_v0  ;;  %v1419_v14 = vld [vmem:[#allocation7] sm:$0xff]  ;;  %v1442_v22 = vld [vmem:[#allocation5 + $0x18] sm:$0xff]   ;;  %v962_v34 = vld [vmem:[#allocation11] ss:$0 sm:$0xff]  ;;  %vm608_vm3 = vcmask 1042434   ;;  %vm610_vm4 = vcmask 1043459  }
  0x82   :  { %v1405_v6 = vsub.s32 1, %v1402_v2  ;;  %v1408_v8 = vsub.s32 0, %v1402_v2  ;;  %988 = vmatprep.subr.bf16.mxu0 %v1024_v5  ;;  %v1415_v12 = vsub.s32 2, %v1402_v2  ;;  %v1422_v15 = vsub.s32 4, %v1402_v2  ;;  %990 = vmatprep.mubr.msk.bf16.mxu0 %vm173_vm1, %v1410_v9  ;;  %s950_s12 = sshll.u32 %s1267_s6, 4  ;;  %s951_s12 = int_to_ptr.vmem [resolvable:$true] %s950_s12 }
  0x83   :  { %v1433_v20 = vsub.s32 3, %v1402_v2  ;;  %v1447_v24 = vsub.s32 5, %v1402_v2  ;;  %v311_v28 = vunpack.c.0.s8 %v310_v27  ;;  %vm612_vm5 = vcmask 1044484   ;;  %s1222_s15 = scalar_lea.vmem %s951_s12, 128  ;;  %p1227_p1 = scmp.lt.s32.totalorder %s951_s12, %s951_s12 }
  0x84   :  { %v478_v17 = vrot.slane %v1419_v14, %v1405_v6  ;;  %1001 = vmatpush3.bf16.msra.mxu1 %v1025_v7  ;;  %v471_v18 = vrot.slane %v1419_v14, %v1408_v8  ;;  %v485_v19 = vrot.slane %v1419_v14, %v1415_v12  ;;  %v499_v21 = vrot.slane %v1419_v14, %v1422_v15  ;;  %p1223_p0 = scmp.ne.s32.totalorder %s951_s12, %s1222_s15  ;;  %p1228_p2 = scmp.lt.s32.totalorder %s1222_s15, %s1222_s15 }
  0x85   :  { %989 = vmatpush3.bf16.msra.mxu0 %v1024_v5  ;;  %v492_v23 = vrot.slane %v1419_v14, %v1433_v20  ;;  %v506_v25 = vrot.slane %v1419_v14, %v1447_v24  ;;  %v314_v29 = vsub.s32 %v311_v28, %v1402_v2  ;;  %vm614_vm6 = vcmask 1045509  }
  0x86   :  { %480 = vbcast.lane.b32.xlu1 %v478_v17, 256  ;;  %473 = vbcast.lane.b32.xlu0 %v471_v18, 256  ;;  %vm616_vm7 = vcmask 1046534   ;;  %vm618_vm8 = vcmask 1047559   ;;  %vm621_vm9 = vcmask 64512   ;;  %p1229_p3 = por %p1228_p2, %p1227_p1 }
  0x87   :  { %1003 = vmatmul.mubr.msk.bf16.vlgmr.msra.gmra.mrb[0].mxu1 %vm173_vm1, %v251_v16 }
  0x88   :  { %991 = vmatmul.mubr.msk.bf16.vlgmr.msra.gmra.mrb[0].mxu0 %vm173_vm1, %v1412_v11  ;;  %p1230_p4 = pnand %p1229_p3, %p1223_p0 }
  0x89   :  { %994 = vmatprep.mubr.msk.bf16.mxu0 %vm173_vm1, %v1417_v13 }
  0x8a   :  { %487 = vbcast.lane.b32.xlu1 %v485_v19, 256  ;;  %501 = vbcast.lane.b32.xlu0 %v499_v21, 256 }
  0x8e   :  { %494 = vbcast.lane.b32.xlu1 %v492_v23, 256 }
  0x90   :  { %995 = vmatmul.mubr.msk.bf16.gmra.mrb[4].mxu0 %vm173_vm1, %v1442_v22 }
  0x92   :  { %508 = vbcast.lane.b32.xlu1 %v506_v25, 256 }
 0x15a   :  { %v301_v30 = vpop.f32.mrb[0].mxu1 }
 0x15b   :  { %v992_v31 = vpop.f32.mrb[0].mxu0  ;;  %v308_v32 = vcombine.high %v301_v30, %v301_v30  ;;  %v315_v33 = vrot.slane %v301_v30, %v314_v29  ;;  %v1004_v35 = vpop.f32.mrb[1].mxu1 }
 0x15c   :  { %v220_v36 = vpop.f32.mrb[1].mxu0  ;;  %v304_v37 = vpop.f32.mrb[2].mxu1  ;;  %v229_v49 = vadd.f32 %v992_v31, %v962_v34 }
 0x15d   :  { %v993_v38 = vpop.f32.mrb[2].mxu0  ;;  %v322_v39 = vrot.slane %v308_v32, %v314_v29  ;;  %v323_v40 = vcombine.high %v315_v33, %v315_v33  ;;  %v331_v41 = vrot.slane %v315_v33, %v314_v29  ;;  %v1005_v42 = vpop.f32.mrb[3].mxu1  ;;  %v221_v44 = vadd.f32 %v962_v34, %v220_v36 }
 0x15e   :  { %v223_v43 = vpop.f32.mrb[3].mxu0  ;;  %v232_v57 = vadd.f32 %v993_v38, %v962_v34 }
 0x15f   :  { %v324_v45 = vcombine.high %v322_v39, %v322_v39  ;;  %v338_v46 = vrot.slane %v322_v39, %v314_v29  ;;  %v345_v47 = vrot.slane %v323_v40, %v314_v29  ;;  %v353_v48 = vcombine.high %v331_v41, %v331_v41  ;;  %v976_v39 = vld [vmem:[#allocation13] ss:$0 sm:$0xff] }
 0x160   :  { %v360_v50 = vrot.slane %v331_v41, %v1408_v8  ;;  %v224_v51 = vadd.f32 %v962_v34, %v223_v43 }
 0x161   :  { %v352_v52 = vrot.slane %v324_v45, %v314_v29  ;;  %v368_v53 = vrot.slane %v353_v48, %v1408_v8  ;;  %v355_v54 = vcombine.high %v345_v47, %v345_v47  ;;  %v364_v55 = vrot.slane %v345_v47, %v1408_v8 }
 0x162   :  { %v397_v56 = vadd.f32 %v360_v50, %v221_v44  ;;  %v354_v59 = vcombine.high %v338_v46, %v338_v46  ;;  %v376_v60 = vrot.slane %v338_v46, %v1408_v8 }
 0x163   :  { %v996_v58 = vpop.f32.mrb[4].mxu0  ;;  %v399_v61 = vadd.f32 %v368_v53, %v229_v49  ;;  %v372_v62 = vrot.slane %v355_v54, %v1408_v8  ;;  %v398_v63 = vadd.f32 %v364_v55, %v224_v51  ;;  %v356_v16 = vcombine.high %v352_v52, %v352_v52 }
 0x164   :  { %v245_v0 = vadd.f32 %v996_v58, %v962_v34  ;;  %v236_v3 = vpop.f32.mrb[5].mxu0  ;;  %v405_v4 = vpack.c.bf16 %v397_v56, %v397_v56  ;;  %v384_v5 = vrot.slane %v354_v59, %v1408_v8  ;;  %v380_v30 = vrot.slane %v352_v52, %v1408_v8 }
 0x165   :  { %v237_v7 = vadd.f32 %v962_v34, %v236_v3  ;;  %v997_v10 = vpop.f32.mrb[6].mxu0  ;;  %v407_v17 = vpack.c.bf16 %v399_v61, %v399_v61  ;;  %v400_v18 = vadd.f32 %v372_v62, %v232_v57  ;;  %v406_v19 = vpack.c.bf16 %v398_v63, %v398_v63 }
 0x166   :  { %v248_v21 = vadd.f32 %v997_v10, %v962_v34  ;;  %v239_v23 = vpop.f32.mrb[7].mxu0  ;;  %1034 = vtanh.bf16 %v405_v4  ;;  %v403_v25 = vadd.f32 %v384_v5, %v245_v0  ;;  %v388_v27 = vrot.slane %v356_v16, %v1408_v8 }
 0x167   :  { %v401_v26 = vadd.f32 %v376_v60, %v237_v7  ;;  %1036 = vtanh.bf16 %v407_v17  ;;  %v408_v28 = vpack.c.bf16 %v400_v18, %v400_v18  ;;  %v240_v29 = vadd.f32 %v962_v34, %v239_v23  ;;  %v481_v23 = vpop.permute.xlu1 %480 }
 0x168   :  { %1038 = vtanh.bf16 %v406_v19  ;;  %v411_v31 = vpack.c.bf16 %v403_v25, %v403_v25  ;;  %v404_v33 = vadd.f32 %v388_v27, %v248_v21  ;;  %v1266_v16 = vmov 0  }
 0x169   :  { %v409_v32 = vpack.c.bf16 %v401_v26, %v401_v26  ;;  %1040 = vtanh.bf16 %v408_v28  ;;  %v402_v35 = vadd.f32 %v380_v30, %v240_v29  ;;  %1020 = vset.pattern.permute.xlu0 %v1266_v16  ;;  %1021 = vset.pattern.permute.xlu1 %v1266_v16  ;;  %v1471_v17 = vsub.s32 7, %v1402_v2  ;;  %v474_v26 = vpop.permute.xlu0 %473 }
 0x16a   :  { %1042 = vtanh.bf16 %v411_v31  ;;  %v412_v36 = vpack.c.bf16 %v404_v33, %v404_v33  ;;  %v1474_v18 = vsub.s32 6, %v1402_v2 }
 0x16b   :  { %1044 = vtanh.bf16 %v409_v32  ;;  %v410_v37 = vpack.c.bf16 %v402_v35, %v402_v35  ;;  %v520_v19 = vrot.slane %v1419_v14, %v1471_v17  ;;  %v488_v25 = vpop.permute.xlu1 %487 }
 0x16c   :  { %1046 = vtanh.bf16 %v412_v36  ;;  %v513_v21 = vrot.slane %v1419_v14, %v1474_v18 }
 0x16d   :  { %1048 = vtanh.bf16 %v410_v37  ;;  %v502_v28 = vpop.permute.xlu0 %501 }
 0x16f   :  { %v495_v27 = vpop.permute.xlu1 %494 }
 0x171   :  { %v1035_v38 = vpop.eup %1034 }
 0x172   :  { %v1037_v40 = vpop.eup %1036  ;;  %v421_v41 = vunpack.c.l.bf16 %v1035_v38 }
 0x173   :  { %v1039_v42 = vpop.eup %1038  ;;  %v423_v34 = vunpack.c.l.bf16 %v1037_v40  ;;  %v509_v29 = vpop.permute.xlu1 %508 }
 0x174   :  { %v1041_v43 = vpop.eup %1040  ;;  %v435_v44 = vmul.f32 %v976_v39, %v421_v41  ;;  %v422_v45 = vunpack.c.l.bf16 %v1039_v42 }
 0x175   :  { %v1043_v46 = vpop.eup %1042  ;;  %v437_v47 = vmul.f32 %v976_v39, %v423_v34  ;;  %v424_v48 = vunpack.c.l.bf16 %v1041_v43 }
 0x176   :  { %v1045_v49 = vpop.eup %1044  ;;  %v443_v50 = vsel %vm173_vm1, %v435_v44, 0.0  ;;  %v436_v51 = vmul.f32 %v976_v39, %v422_v45  ;;  %v427_v52 = vunpack.c.l.bf16 %v1043_v46 }
 0x177   :  { %v1047_v53 = vpop.eup %1046  ;;  %444 = vadd.xlane.f32.xlu0 %v443_v50  ;;  %v449_v54 = vsel %vm173_vm1, %v437_v47, 0.0  ;;  %v438_v55 = vmul.f32 %v976_v39, %v424_v48  ;;  %v425_v60 = vunpack.c.l.bf16 %v1045_v49  ;;  %v573_v47 = vand.u32 127, %v312_v1 }
 0x178   :  { %v1049_v56 = vpop.eup %1048  ;;  %450 = vadd.xlane.f32.xlu1 %v449_v54  ;;  %v428_v57 = vunpack.c.l.bf16 %v1047_v53  ;;  %v446_v58 = vsel %vm173_vm1, %v436_v51, 0.0  ;;  %v441_v59 = vmul.f32 %v976_v39, %v427_v52 }
 0x179   :  { %v452_v61 = vsel %vm173_vm1, %v438_v55, 0.0  ;;  %v426_v63 = vunpack.c.l.bf16 %v1049_v56  ;;  %v439_v3 = vmul.f32 %v976_v39, %v425_v60  ;;  %v1497_v48 = vsub.s32 %v573_v47, %v1402_v2 }
 0x17a   :  { %v442_v62 = vmul.f32 %v976_v39, %v428_v57  ;;  %v461_v0 = vsel %vm173_vm1, %v441_v59, 0.0 }
 0x17b   :  { %447 = vadd.xlane.f32.xlu0 %v446_v58  ;;  %v440_v5 = vmul.f32 %v976_v39, %v426_v63  ;;  %v455_v7 = vsel %vm173_vm1, %v439_v3, 0.0 }
 0x17c   :  { %453 = vadd.xlane.f32.xlu1 %v452_v61  ;;  %v464_v4 = vsel %vm173_vm1, %v442_v62, 0.0 }
 0x17d   :  { %v458_v10 = vsel %vm173_vm1, %v440_v5, 0.0 }
 0x17f   :  { %462 = vadd.xlane.f32.xlu0 %v461_v0 }
 0x180   :  { %465 = vadd.xlane.f32.xlu1 %v464_v4 }
 0x183   :  { %456 = vadd.xlane.f32.xlu0 %v455_v7 }
 0x184   :  { %459 = vadd.xlane.f32.xlu1 %v458_v10 }
 0x195   :  { %522 = vbcast.lane.b32.xlu1 %v520_v19, 256 }
 0x199   :  { %515 = vbcast.lane.b32.xlu0 %v513_v21, 256 }
 0x204   :  { %v445_v30 = vpop.xlane.xlu0 %444 }
 0x205   :  { %v1480_v31 = vadd.f32 %v474_v26, %v445_v30  ;;  %v451_v32 = vpop.xlane.xlu1 %450 }
 0x206   :  { %v534_v38 = vadd.f32 %v488_v25, %v451_v32 }
 0x207   :  { %549 = vperm.xlu0 %1020, %v1480_v31  }
 0x208   :  { %v448_v33 = vpop.xlane.xlu0 %447 }
 0x209   :  { %v533_v35 = vadd.f32 %v481_v23, %v448_v33  ;;  %v454_v36 = vpop.xlane.xlu1 %453 }
 0x20a   :  { %v1483_v37 = vadd.f32 %v495_v27, %v454_v36 }
 0x20b   :  { %552 = vperm.xlu1 %1021, %v533_v35  }
 0x20c   :  { %v463_v14 = vpop.xlane.xlu0 %462  ;;  %558 = vperm.xlu0 %1020, %v1483_v37  }
 0x20d   :  { %v466_v39 = vpop.xlane.xlu1 %465 }
 0x20f   :  { %555 = vperm.xlu1 %1021, %v534_v38  }
 0x210   :  { %v457_v40 = vpop.xlane.xlu0 %456 }
 0x211   :  { %v536_v41 = vadd.f32 %v502_v28, %v457_v40  ;;  %v460_v42 = vpop.xlane.xlu1 %459 }
 0x212   :  { %v1486_v34 = vadd.f32 %v509_v29, %v460_v42 }
 0x213   :  { %561 = vperm.xlu1 %1021, %v536_v41  }
 0x214   :  { %v516_v43 = vpop.permute.xlu0 %515  ;;  %564 = vperm.xlu0 %1020, %v1486_v34  }
 0x215   :  { %v1489_v44 = vadd.f32 %v516_v43, %v463_v14  ;;  %v523_v45 = vpop.permute.xlu1 %522 }
 0x216   :  { %v1491_v46 = vadd.f32 %v523_v45, %v466_v39 }
 0x217   :  { %567 = vperm.xlu1 %1021, %v1489_v44  }
 0x218   :  { %570 = vperm.xlu0 %1020, %v1491_v46  }
 0x286   :  { %v550_v50 = vpop.permute.xlu0 %549 }
 0x287   :  { %v577_v52 = vrot.slane %v550_v50, %v1497_v48 }
 0x28a   :  { %v553_v49 = vpop.permute.xlu1 %552 }
 0x28b   :  { %v581_v51 = vrot.slane %v553_v49, %v1497_v48  ;;  %v559_v54 = vpop.permute.xlu0 %558 }
 0x28c   :  { %v589_v1 = vrot.slane %v559_v54, %v1497_v48 }
 0x28d   :  { %v607_v56 = vsel %vm606_vm2, %v581_v51, %v577_v52 }
 0x28e   :  { %v556_v53 = vpop.permute.xlu1 %555 }
 0x28f   :  { %v585_v55 = vrot.slane %v556_v53, %v1497_v48 }
 0x291   :  { %v609_v57 = vsel %vm608_vm3, %v585_v55, %v607_v56 }
 0x292   :  { %v562_v2 = vpop.permute.xlu1 %561  ;;  %v611_v60 = vsel %vm610_vm4, %v589_v1, %v609_v57 }
 0x293   :  { %v593_v58 = vrot.slane %v562_v2, %v1497_v48  ;;  %v565_v59 = vpop.permute.xlu0 %564 }
 0x294   :  { %v597_v61 = vrot.slane %v565_v59, %v1497_v48 }
 0x295   :  { %v613_v62 = vsel %vm612_vm5, %v593_v58, %v611_v60 }
 0x296   :  { %v615_v63 = vsel %vm614_vm6, %v597_v61, %v613_v62  ;;  %v568_v0 = vpop.permute.xlu1 %567 }
 0x297   :  { %v601_v3 = vrot.slane %v568_v0, %v1497_v48  ;;  %v571_v4 = vpop.permute.xlu0 %570 }
 0x298   :  { %v605_v5 = vrot.slane %v571_v4, %v1497_v48 }
 0x299   :  { %v617_v7 = vsel %vm616_vm7, %v601_v3, %v615_v63 }
 0x29a   :  { %v619_v10 = vsel %vm618_vm8, %v605_v5, %v617_v7 }
 0x29b   :  { %v622_v16 = vsel %vm621_vm9, %v619_v10, -inf }
 0x29c   :  { %623 = vmax.xlane.f32.xlu1 %v622_v16 }
 0x329   :  { %v624_v19 = vpop.xlane.xlu1 %623 }
 0x32a   :  { %v629_v21 = vrot.slane %v624_v19, %v1408_v8  ;;  %v633_v23 = vrot.slane %v624_v19, %v1405_v6  ;;  %v637_v25 = vrot.slane %v624_v19, %v1415_v12  ;;  %v641_v29 = vrot.slane %v624_v19, %v1433_v20 }
 0x32b   :  { %v645_v33 = vrot.slane %v624_v19, %v1422_v15  ;;  %v649_v39 = vrot.slane %v624_v19, %v1447_v24  ;;  %v657_v47 = vrot.slane %v624_v19, %v1471_v17 }
 0x32c   :  { %v666_v26 = vsub.f32 %v1480_v31, %v629_v21  ;;  %v667_v27 = vsub.f32 %v533_v35, %v633_v23  ;;  %v668_v30 = vsub.f32 %v534_v38, %v637_v25  ;;  %v669_v36 = vsub.f32 %v1483_v37, %v641_v29 }
 0x32d   :  { %v670_v40 = vsub.f32 %v536_v41, %v645_v33  ;;  %v653_v31 = vrot.slane %v624_v19, %v1474_v18  ;;  %v671_v35 = vsub.f32 %v1486_v34, %v649_v39  ;;  %v673_v41 = vsub.f32 %v1491_v46, %v657_v47 }
 0x32e   :  { %v674_v28 = vmul.f32 1.442695, %v666_v26  ;;  %v676_v32 = vmul.f32 1.442695, %v667_v27  ;;  %v678_v14 = vmul.f32 1.442695, %v668_v30 }
 0x32f   :  { %v680_v42 = vmul.f32 1.442695, %v669_v36  ;;  %v682_v38 = vmul.f32 1.442695, %v670_v40  ;;  %v672_v37 = vsub.f32 %v1489_v44, %v653_v31  ;;  %v684_v49 = vmul.f32 1.442695, %v671_v35 }
 0x330   :  { %1050 = vpow2.f32 %v674_v28  ;;  %v688_v34 = vmul.f32 1.442695, %v673_v41 }
 0x331   :  { %1052 = vpow2.f32 %v676_v32  ;;  %v686_v51 = vmul.f32 1.442695, %v672_v37  ;;  %v819_v37 = vunpack.c.l.bf16 %v1417_v13 }
 0x332   :  { %1054 = vpow2.f32 %v678_v14 }
 0x333   :  { %1056 = vpow2.f32 %v680_v42 }
 0x334   :  { %1058 = vpow2.f32 %v682_v38 }
 0x335   :  { %1060 = vpow2.f32 %v684_v49 }
 0x336   :  { %1062 = vpow2.f32 %v686_v51 }
 0x337   :  { %1064 = vpow2.f32 %v688_v34 }
 0x33a   :  { %v1051_v43 = vpop.eup %1050 }
 0x33b   :  { %699 = vperm.xlu0 %1020, %v1051_v43   ;;  %v1053_v45 = vpop.eup %1052 }
 0x33c   :  { %v1055_v50 = vpop.eup %1054 }
 0x33d   :  { %v1057_v52 = vpop.eup %1056 }
 0x33e   :  { %v1059_v53 = vpop.eup %1058 }
 0x33f   :  { %702 = vperm.xlu0 %1020, %v1053_v45   ;;  %v1061_v54 = vpop.eup %1060 }
 0x340   :  { %v1063_v55 = vpop.eup %1062 }
 0x341   :  { %v1065_v44 = vpop.eup %1064 }
 0x343   :  { %705 = vperm.xlu0 %1020, %v1055_v50  }
 0x347   :  { %708 = vperm.xlu0 %1020, %v1057_v52  }
 0x34b   :  { %711 = vperm.xlu0 %1020, %v1059_v53  }
 0x34f   :  { %714 = vperm.xlu0 %1020, %v1061_v54  }
 0x353   :  { %717 = vperm.xlu0 %1020, %v1063_v55  }
 0x357   :  { %720 = vperm.xlu0 %1020, %v1065_v44  }
 0x3ba   :  { %v700_v56 = vpop.permute.xlu0 %699 }
 0x3bb   :  { %v725_v61 = vrot.slane %v700_v56, %v1497_v48 }
 0x3be   :  { %v703_v57 = vpop.permute.xlu0 %702 }
 0x3bf   :  { %v729_v59 = vrot.slane %v703_v57, %v1497_v48 }
 0x3c1   :  { %v754_v3 = vsel %vm606_vm2, %v729_v59, %v725_v61 }
 0x3c2   :  { %v706_v1 = vpop.permute.xlu0 %705 }
 0x3c3   :  { %v733_v60 = vrot.slane %v706_v1, %v1497_v48 }
 0x3c5   :  { %v755_v5 = vsel %vm608_vm3, %v733_v60, %v754_v3 }
 0x3c6   :  { %v709_v2 = vpop.permute.xlu0 %708 }
 0x3c7   :  { %v737_v62 = vrot.slane %v709_v2, %v1497_v48 }
 0x3c9   :  { %v756_v10 = vsel %vm610_vm4, %v737_v62, %v755_v5  ;;  %v821_v5 = vunpack.c.l.bf16 %v1442_v22 }
 0x3ca   :  { %v712_v46 = vpop.permute.xlu0 %711 }
 0x3cb   :  { %v741_v63 = vrot.slane %v712_v46, %v1497_v48 }
 0x3cd   :  { %v757_v16 = vsel %vm612_vm5, %v741_v63, %v756_v10 }
 0x3ce   :  { %v715_v58 = vpop.permute.xlu0 %714 }
 0x3cf   :  { %v745_v4 = vrot.slane %v715_v58, %v1497_v48  ;;  %v820_v58 = vunpack.c.h.bf16 %v1417_v13 }
 0x3d1   :  { %v758_v21 = vsel %vm614_vm6, %v745_v4, %v757_v16 }
 0x3d2   :  { %v718_v0 = vpop.permute.xlu0 %717 }
 0x3d3   :  { %v749_v7 = vrot.slane %v718_v0, %v1497_v48 }
 0x3d5   :  { %v759_v25 = vsel %vm616_vm7, %v749_v7, %v758_v21 }
 0x3d6   :  { %v721_v19 = vpop.permute.xlu0 %720 }
 0x3d7   :  { %v753_v23 = vrot.slane %v721_v19, %v1497_v48 }
 0x3d9   :  { %v760_v26 = vsel %vm618_vm8, %v753_v23, %v759_v25 }
 0x3da   :  { %v762_v27 = vsel %vm621_vm9, %v760_v26, 0.0 }
 0x3db   :  { %763 = vadd.xlane.f32.xlu0 %v762_v27 }
 0x468   :  { %v764_v28 = vpop.xlane.xlu0 %763 }
 0x469   :  { %1066 = vrcp.f32 %v764_v28  ;;  %v822_v28 = vunpack.c.h.bf16 %v1442_v22 }
 0x473   :  { %v1067_v29 = vpop.eup %1066 }
 0x474   :  { %v786_v30 = vrot.slane %v1067_v29, %v1422_v15  ;;  %v770_v32 = vrot.slane %v1067_v29, %v1408_v8  ;;  %v774_v14 = vrot.slane %v1067_v29, %v1405_v6  ;;  %v778_v39 = vrot.slane %v1067_v29, %v1415_v12 }
 0x475   :  { %v782_v42 = vrot.slane %v1067_v29, %v1433_v20  ;;  %v790_v35 = vrot.slane %v1067_v29, %v1447_v24  ;;  %v794_v8 = vrot.slane %v1067_v29, %v1474_v18  ;;  %v798_v6 = vrot.slane %v1067_v29, %v1471_v17 }
 0x476   :  { %v811_v33 = vmul.f32 %v1059_v53, %v786_v30  ;;  %v807_v36 = vmul.f32 %v1051_v43, %v770_v32  ;;  %v808_v48 = vmul.f32 %v1053_v45, %v774_v14  ;;  %v809_v40 = vmul.f32 %v1055_v50, %v778_v39 }
 0x477   :  { %v810_v31 = vmul.f32 %v1057_v52, %v782_v42  ;;  %v812_v15 = vmul.f32 %v1061_v54, %v790_v35  ;;  %v813_v43 = vmul.f32 %v1063_v55, %v794_v8  ;;  %v814_v38 = vmul.f32 %v1065_v44, %v798_v6 }
 0x478   :  { %845 = vperm.xlu0 %1020, %v811_v33   ;;  %825 = vperm.xlu1 %1021, %v807_v36   ;;  %v815_v12 = vunpack.c.l.bf16 %v1410_v9  ;;  %v816_v20 = vunpack.c.h.bf16 %v1410_v9  ;;  %v817_v18 = vunpack.c.l.bf16 %v1412_v11  ;;  %v818_v55 = vunpack.c.h.bf16 %v1412_v11 }
 0x47c   :  { %830 = vperm.xlu1 %1021, %v808_v48  }
 0x480   :  { %835 = vperm.xlu1 %1021, %v809_v40  }
 0x484   :  { %840 = vperm.xlu1 %1021, %v810_v31  }
 0x488   :  { %850 = vperm.xlu1 %1021, %v812_v15  }
 0x48c   :  { %855 = vperm.xlu1 %1021, %v813_v43  }
 0x490   :  { %860 = vperm.xlu1 %1021, %v814_v38  }
 0x4f7   :  { %v826_v45 = vpop.permute.xlu1 %825  ;;  %v846_v49 = vpop.permute.xlu0 %845 }
 0x4f8   :  { %v863_v47 = vmul.f32 %v826_v45, %v815_v12  ;;  %v867_v51 = vmul.f32 %v846_v49, %v819_v37 }
 0x4fa   :  { %v871_v41 = vsel %vm173_vm1, %v863_v47, 0.0  ;;  %v899_v44 = vsel %vm173_vm1, %v867_v51, 0.0 }
 0x4fb   :  { %v831_v24 = vpop.permute.xlu1 %830  ;;  %v872_v53 = vrot.slane %v871_v41, 4  ;;  %v900_v60 = vrot.slane %v899_v44, 4 }
 0x4fc   :  { %v864_v50 = vmul.f32 %v831_v24, %v816_v20 }
 0x4fd   :  { %v873_v2 = vadd.f32 %v872_v53, %v871_v41  ;;  %v901_v10 = vadd.f32 %v900_v60, %v899_v44 }
 0x4fe   :  { %v878_v17 = vsel %vm173_vm1, %v864_v50, 0.0 }
 0x4ff   :  { %v879_v52 = vrot.slane %v878_v17, 4  ;;  %v836_v34 = vpop.permute.xlu1 %835  ;;  %v874_v3 = vrot.slane %v873_v2, 2  ;;  %v902_v32 = vrot.slane %v901_v10, 2 }
 0x500   :  { %v865_v54 = vmul.f32 %v836_v34, %v817_v18 }
 0x501   :  { %v880_v56 = vadd.f32 %v879_v52, %v878_v17  ;;  %v875_v25 = vadd.f32 %v874_v3, %v873_v2  ;;  %v903_v43 = vadd.f32 %v902_v32, %v901_v10 }
 0x502   :  { %v885_v9 = vsel %vm173_vm1, %v865_v54, 0.0 }
 0x503   :  { %v886_v57 = vrot.slane %v885_v9, 4  ;;  %v841_v1 = vpop.permute.xlu1 %840  ;;  %v881_v62 = vrot.slane %v880_v56, 2  ;;  %v876_v40 = vrot.slane %v875_v25, 1  ;;  %v904_v50 = vrot.slane %v903_v43, 1 }
 0x504   :  { %v866_v46 = vmul.f32 %v841_v1, %v818_v55 }
 0x505   :  { %v887_v59 = vadd.f32 %v886_v57, %v885_v9  ;;  %v882_v19 = vadd.f32 %v881_v62, %v880_v56  ;;  %v877_v45 = vadd.f32 %v876_v40, %v875_v25  ;;  %v905_v54 = vadd.f32 %v904_v50, %v903_v43 }
 0x506   :  { %v892_v61 = vsel %vm173_vm1, %v866_v46, 0.0 }
 0x507   :  { %v893_v63 = vrot.slane %v892_v61, 4  ;;  %v851_v0 = vpop.permute.xlu1 %850  ;;  %v888_v11 = vrot.slane %v887_v59, 2  ;;  %v883_v36 = vrot.slane %v882_v19, 1 }
 0x508   :  { %v868_v4 = vmul.f32 %v851_v0, %v820_v58 }
 0x509   :  { %v894_v7 = vadd.f32 %v893_v63, %v892_v61  ;;  %v889_v26 = vadd.f32 %v888_v11, %v887_v59  ;;  %v884_v38 = vadd.f32 %v883_v36, %v882_v19 }
 0x50a   :  { %v906_v16 = vsel %vm173_vm1, %v868_v4, 0.0 }
 0x50b   :  { %v895_v21 = vrot.slane %v894_v7, 2  ;;  %v907_v23 = vrot.slane %v906_v16, 4  ;;  %v856_v13 = vpop.permute.xlu1 %855  ;;  %v890_v42 = vrot.slane %v889_v26, 1  ;;  %v935_v18 = vsel %vm606_vm2, %v884_v38, %v877_v45 }
 0x50c   :  { %v869_v27 = vmul.f32 %v856_v13, %v821_v5 }
 0x50d   :  { %v896_v29 = vadd.f32 %v895_v21, %v894_v7  ;;  %v908_v30 = vadd.f32 %v907_v23, %v906_v16  ;;  %v891_v20 = vadd.f32 %v890_v42, %v889_v26 }
 0x50e   :  { %v913_v33 = vsel %vm173_vm1, %v869_v27, 0.0 }
 0x50f   :  { %v909_v14 = vrot.slane %v908_v30, 2  ;;  %v914_v48 = vrot.slane %v913_v33, 4  ;;  %v861_v39 = vpop.permute.xlu1 %860  ;;  %v897_v35 = vrot.slane %v896_v29, 1  ;;  %v936_v51 = vsel %vm608_vm3, %v891_v20, %v935_v18 }
 0x510   :  { %v870_v31 = vmul.f32 %v861_v39, %v822_v28 }
 0x511   :  { %v910_v15 = vadd.f32 %v909_v14, %v908_v30  ;;  %v915_v8 = vadd.f32 %v914_v48, %v913_v33  ;;  %v898_v47 = vadd.f32 %v897_v35, %v896_v29 }
 0x512   :  { %v920_v6 = vsel %vm173_vm1, %v870_v31, 0.0 }
 0x513   :  { %v916_v22 = vrot.slane %v915_v8, 2  ;;  %v921_v12 = vrot.slane %v920_v6, 4  ;;  %v911_v37 = vrot.slane %v910_v15, 1  ;;  %v937_v52 = vsel %vm610_vm4, %v898_v47, %v936_v51 }
 0x514   :  { %v938_v44 = vsel %vm612_vm5, %v905_v54, %v937_v52 }
 0x515   :  { %v917_v24 = vadd.f32 %v916_v22, %v915_v8  ;;  %v922_v49 = vadd.f32 %v921_v12, %v920_v6  ;;  %v912_v34 = vadd.f32 %v911_v37, %v910_v15 }
 0x517   :  { %v918_v41 = vrot.slane %v917_v24, 1  ;;  %v923_v17 = vrot.slane %v922_v49, 2  ;;  %v939_v57 = vsel %vm614_vm6, %v912_v34, %v938_v44 }
 0x519   :  { %v924_v53 = vadd.f32 %v923_v17, %v922_v49  ;;  %v919_v55 = vadd.f32 %v918_v41, %v917_v24 }
 0x51b   :  { %v925_v9 = vrot.slane %v924_v53, 1  ;;  %v940_v1 = vsel %vm616_vm7, %v919_v55, %v939_v57 }
 0x51d   :  { %v926_v56 = vadd.f32 %v925_v9, %v924_v53 }
 0x51f   :  { %v941_v2 = vsel %vm618_vm8, %v926_v56, %v940_v1 }
 0x520   :  { %943 = vst.msk [vmem:[#allocation14] sm:$0xff] %vm173_vm1, %v941_v2 }
 0x521   :  { %1233 = shalt.err (!%p1230_p4)
}
 0x522   :  { %s1234_s16 = scalar_lea.hbm %s1595_s7, 128 }
 0x523   :  { %p1235_p5 = scmp.ne.s32.totalorder %s1595_s7, %s1234_s16  ;;  %p1238_p6 = scmp.lt.u32.totalorder %s1234_s16, %s1595_s7 }
 0x525   :  { %p1240_p7 = pnand %p1238_p6, %p1235_p5 }
 0x527   :  { %1243 = shalt.err (!%p1240_p7)
}
 0x528   :  { %953 = dma.vmem_to_hbm [thread:$0]  %s951_s12, 128, %s1595_s7, [#allocation4]  }
 0x529   :  { %1252 = dma.done.wait [#allocation4], 128  }
 0x52a   :  { %1253 = vsyncadd [#allocation4], 4294967168 }
 0x52b   :  { %957 = vsyncpa [#allocation3], 1 }
 0x52c   :  { %958 = vsyncpa [#allocation6], 1 }
 0x52d   :  { %959 = vsyncpa [#allocation9], 1 }
 0x52e   :  { %960 = vsyncpa [#allocation12], 1 }
 0x52f   :  { %961 = vsyncpa [#allocation4], 1 }

</bundles_post_ra>
